<compile_context>
chip_gen: v7x
topology: tpu7x:2x2x1
jax: 0.10.0
libtpu: 0.0.40
codegen_flags: <defaults>
</compile_context>

<pallas_src>
import numpy as np
import jax
import jax.numpy as jnp
from jax.experimental import pallas as pl
from jax.experimental.pallas import tpu as pltpu


def _round_up(x, m):
    return ((x + m - 1) // m) * m


def build_rotation_matrix(H, W, angle_deg):
    """Dense (HW, HW) bilinear-interpolation rotation matrix, scipy rotate
    (reshape=False, mode='constant', cval=0) coordinate convention."""
    theta = np.deg2rad(angle_deg)
    c, s = np.cos(theta), np.sin(theta)
    # scipy: input_coord = rot @ output_coord + offset  (coords are (row, col))
    rot = np.array([[c, s], [-s, c]], dtype=np.float64)
    center = np.array([(H - 1) / 2.0, (W - 1) / 2.0])
    offset = center - rot @ center
    R = np.zeros((H * W, H * W), dtype=np.float32)
    for i in range(H):
        for j in range(W):
            y, x = rot @ np.array([float(i), float(j)]) + offset
            y0, x0 = int(np.floor(y)), int(np.floor(x))
            dy, dx = y - y0, x - x0
            out_idx = i * W + j
            for yy, wy in ((y0, 1.0 - dy), (y0 + 1, dy)):
                for xx, wx in ((x0, 1.0 - dx), (x0 + 1, dx)):
                    if 0 <= yy < H and 0 <= xx < W:
                        R[out_idx, yy * W + xx] += wy * wx
    return R


def prepare_rotation_operator(H, W, angle_deg, lane_align=256):
    """Returns (R^T padded to lane_align multiples, bf16), 1/sum(rotate(ones)),
    the padded HW, and the unpadded f32 R (for reference checks)."""
    R = build_rotation_matrix(H, W, angle_deg)
    HW = H * W
    HW_pad = _round_up(HW, lane_align)
    inv_denom = 1.0 / float(R.sum())          # == 1 / sum(rotate(ones))
    Rt_pad = np.zeros((HW_pad, HW_pad), dtype=np.float32)
    Rt_pad[:HW, :HW] = R.T                    # zero padding keeps padded cols exact
    return jnp.asarray(Rt_pad, dtype=jnp.bfloat16), inv_denom, HW_pad, R


def rotation_loss_kernel(inv_denom_ref, fm1_ref, fm2_ref, rt_ref, out_ref):
    """inv_denom_ref: (1,) f32 SMEM scalar-prefetch.
    fm1_ref, fm2_ref: (TB, HW_pad) f32 batch tile.
    rt_ref: (HW_pad, HW_pad) bf16 R^T (resident: constant index_map).
    out_ref: (TB, 128) f32 — per-image loss broadcast across lanes."""
    # Widen R to f32 in-kernel (DMA stays bf16; feature values are never
    # quantized) and rotate the whole batch tile with one MXU matmul:
    # (TB, HW) @ (HW, HW), f32 accumulation.
    rt = rt_ref[...].astype(jnp.float32)
    r_fm2 = jnp.dot(fm2_ref[...], rt, preferred_element_type=jnp.float32)
    diff = fm1_ref[...] - r_fm2
    num = jnp.sum(diff * diff, axis=-1, keepdims=True)      # (TB, 1)
    # Denominator sum(rotate(ones)) is a constant of (H, W, angle): multiply by
    # its precomputed reciprocal (SMEM scalar -> no recompile across angles).
    loss = num * inv_denom_ref[0]
    out_ref[...] = jnp.broadcast_to(loss, out_ref.shape)


def scipy_rotation_loss(fm1, fm2, rt_bf16, inv_denom, *, block_b=None):
    """fm1, fm2: (H, W) or (B, H, W).  Returns a scalar loss (single pair,
    matching the PyTorch module) or per-image losses (B,)."""
    orig_dtype = fm1.dtype
    single = fm1.ndim == 2
    if single:
        fm1, fm2 = fm1[None], fm2[None]
    B, H, W = fm1.shape
    HW = H * W
    HW_pad = rt_bf16.shape[0]
    assert rt_bf16.shape == (HW_pad, HW_pad) and HW_pad >= HW

    # Batch tile: fill the MXU M dimension when the batch is large; otherwise
    # round up to the f32 sublane tile (8).  Padded rows are zero -> loss 0.
    if block_b is None:
        TB = 256 if B > 256 else _round_up(B, 8)
    else:
        TB = _round_up(block_b, 8)
    B_pad = _round_up(B, TB)
    nb = B_pad // TB

    def _prep(fm):
        x = fm.reshape(B, HW).astype(jnp.float32)
        return jnp.pad(x, ((0, B_pad - B), (0, HW_pad - HW)))

    fm1_flat = _prep(fm1)
    fm2_flat = _prep(fm2)
    inv = jnp.asarray([inv_denom], dtype=jnp.float32)

    cost = pl.CostEstimate(
        flops=int(2 * B_pad * HW_pad * HW_pad + 3 * B_pad * HW_pad),
        transcendentals=0,
        bytes_accessed=int(2 * HW_pad * HW_pad      # bf16 R^T (fetched once)
                           + 2 * 4 * B_pad * HW_pad  # f32 fm1 + fm2
                           + 4 * B_pad * 128),       # f32 output slab
    )

    out = pl.pallas_call(
        rotation_loss_kernel,
        out_shape=jax.ShapeDtypeStruct((B_pad, 128), jnp.float32),
        grid_spec=pltpu.PrefetchScalarGridSpec(
            num_scalar_prefetch=1,          # inv_denom -> SMEM
            grid=(nb,),                     # batch tiles
            in_specs=[
                pl.BlockSpec((TB, HW_pad), lambda b, inv_ref: (b, 0)),       # fm1
                pl.BlockSpec((TB, HW_pad), lambda b, inv_ref: (b, 0)),       # fm2
                pl.BlockSpec((HW_pad, HW_pad), lambda b, inv_ref: (0, 0)),   # R^T (resident)
            ],
            out_specs=pl.BlockSpec((TB, 128), lambda b, inv_ref: (b, 0)),
        ),
        compiler_params=pltpu.CompilerParams(
            dimension_semantics=("parallel",),        # shard batch across TCs (v7x)
            vmem_limit_bytes=48 * 1024 * 1024,        # > scoped defaults, < v7x physical
        ),
        cost_estimate=cost,
    )(inv, fm1_flat, fm2_flat, rt_bf16)

    losses = out[:B, 0]
    if single:
        return losses[0].astype(orig_dtype)
    return losses.astype(orig_dtype)


if __name__ == "__main__":
    H, W = 16, 16
    HW = H * W
    angle = 5.0

    # Precompute the rotation operator once (glue code, compile-time constants).
    rt_bf16, inv_denom, HW_pad, R_f32 = prepare_rotation_operator(H, W, angle)

    key = jax.random.PRNGKey(0)
    k1, k2, k3, k4 = jax.random.split(key, 4)
    fm1 = jax.random.normal(k1, (H, W), dtype=jnp.float32)
    fm2 = jax.random.normal(k2, (H, W), dtype=jnp.float32)

    # --- single pair (module semantics) ---
    loss = scipy_rotation_loss(fm1, fm2, rt_bf16, inv_denom)
    jax.block_until_ready(loss)

    # Pure-JAX f32 bilinear reference (only R is bf16 in the kernel -> loose tol).
    r_fm2_ref = (jnp.asarray(R_f32) @ fm2.reshape(-1)).reshape(H, W)
    ref_loss = jnp.sum((fm1 - r_fm2_ref) ** 2) * inv_denom
    assert jnp.allclose(loss, ref_loss, rtol=2e-2, atol=1e-3), (loss, ref_loss)

    # --- batched path: amortizes R across the MXU M dimension and exercises
    # the multi-step batch grid (block_b=8 -> 2 grid steps, R resident). ---
    B = 12
    fm1_b = jax.random.normal(k3, (B, H, W), dtype=jnp.float32)
    fm2_b = jax.random.normal(k4, (B, H, W), dtype=jnp.float32)
    losses = scipy_rotation_loss(fm1_b, fm2_b, rt_bf16, inv_denom, block_b=8)
    jax.block_until_ready(losses)

    r_b = fm2_b.reshape(B, HW) @ jnp.asarray(R_f32).T
    ref_losses = jnp.sum((fm1_b.reshape(B, HW) - r_b) ** 2, axis=-1) * inv_denom
    assert jnp.allclose(losses, ref_losses, rtol=2e-2, atol=1e-3), (losses, ref_losses)

    # Auto batch-tile path (single grid step, TB = round_up(B, 8)).
    losses2 = scipy_rotation_loss(fm1_b, fm2_b, rt_bf16, inv_denom)
    jax.block_until_ready(losses2)
    assert jnp.allclose(losses2, ref_losses, rtol=2e-2, atol=1e-3), (losses2, ref_losses)

    print("KERNEL_OK")
</pallas_src>

<mosaic_0001>
module attributes {stable_mosaic.version = 11 : i64} {
  func.func @rotation_loss_kernel(%arg0: i32, %arg1: memref<1xf32, #tpu.memory_space<smem>>, %arg2: memref<8x256xf32, #tpu.memory_space<vmem>>, %arg3: memref<8x256xf32, #tpu.memory_space<vmem>>, %arg4: memref<256x256xbf16, #tpu.memory_space<vmem>>, %arg5: memref<8x128xf32, #tpu.memory_space<vmem>>) attributes {dimension_semantics = [#tpu.dimension_semantics<parallel>], iteration_bounds = array<i64: 1>, scalar_prefetch = 1 : i64, scratch_operands = 0 : i64, tpu.core_type = #tpu.core_type<tc>, window_params = [{transform_indices = @transform_0, window_bounds = array<i64: 8, 256>}, {transform_indices = @transform_1, window_bounds = array<i64: 8, 256>}, {pipeline_mode = #tpu.pipeline_mode<synchronous>, transform_indices = @transform_2, window_bounds = array<i64: 256, 256>}, {transform_indices = @transform_3, window_bounds = array<i64: 8, 128>}]} {
    %c0 = arith.constant 0 : index
    %c0_0 = arith.constant 0 : index
    %0 = vector.load %arg4[%c0, %c0_0] : memref<256x256xbf16, #tpu.memory_space<vmem>>, vector<256x256xbf16>
    %1 = arith.extf %0 : vector<256x256xbf16> to vector<256x256xf32>
    %c0_1 = arith.constant 0 : index
    %c0_2 = arith.constant 0 : index
    %2 = vector.load %arg3[%c0_1, %c0_2] : memref<8x256xf32, #tpu.memory_space<vmem>>, vector<8x256xf32>
    %cst = arith.constant dense<0.000000e+00> : vector<8x256xf32>
    %3 = tpu.matmul %2, %1, %cst {dimension_numbers = #tpu.dot_dimension_numbers<[1], [0], [0], [1], [0, 0, 1, 1], [], []>} : vector<8x256xf32>, vector<256x256xf32>, vector<8x256xf32> -> vector<8x256xf32>
    %c0_3 = arith.constant 0 : index
    %c0_4 = arith.constant 0 : index
    %4 = vector.load %arg2[%c0_3, %c0_4] : memref<8x256xf32, #tpu.memory_space<vmem>>, vector<8x256xf32>
    %5 = arith.subf %4, %3 : vector<8x256xf32>
    %6 = arith.mulf %5, %5 : vector<8x256xf32>
    %cst_5 = arith.constant dense<0.000000e+00> : vector<8xf32>
    %7 = vector.multi_reduction <add>, %6, %cst_5 [1] : vector<8x256xf32> to vector<8xf32>
    %8 = vector.shape_cast %7 : vector<8xf32> to vector<8x1xf32>
    %c0_6 = arith.constant 0 : index
    %9 = memref.load %arg1[%c0_6] : memref<1xf32, #tpu.memory_space<smem>>
    %10 = vector.broadcast %9 : f32 to vector<8x1xf32>
    %11 = arith.mulf %8, %10 : vector<8x1xf32>
    %12 = vector.shape_cast %11 : vector<8x1xf32> to vector<8x1xf32>
    %13 = vector.broadcast %12 : vector<8x1xf32> to vector<8x128xf32>
    %c0_7 = arith.constant 0 : index
    %c0_8 = arith.constant 0 : index
    %14 = vector.load %arg5[%c0_7, %c0_8] : memref<8x128xf32, #tpu.memory_space<vmem>>, vector<8x128xf32>
    tpu.vector_store %arg5[%c0_7, %c0_8], %13 {strides = array<i32>} : memref<8x128xf32, #tpu.memory_space<vmem>>, vector<8x128xf32>,
    return
  }
  func.func @transform_0(%arg0: i32, %arg1: memref<1xf32, #tpu.memory_space<smem>>) -> (i32, i32) {
    %c0_i32 = arith.constant 0 : i32
    %c0_i32_0 = arith.constant 0 : i32
    return %arg0, %c0_i32 : i32, i32
  }
  func.func @transform_1(%arg0: i32, %arg1: memref<1xf32, #tpu.memory_space<smem>>) -> (i32, i32) {
    %c0_i32 = arith.constant 0 : i32
    %c0_i32_0 = arith.constant 0 : i32
    return %arg0, %c0_i32 : i32, i32
  }
  func.func @transform_2(%arg0: i32, %arg1: memref<1xf32, #tpu.memory_space<smem>>) -> (i32, i32) {
    %c0_i32 = arith.constant 0 : i32
    %c0_i32_0 = arith.constant 0 : i32
    %c0_i32_1 = arith.constant 0 : i32
    return %c0_i32, %c0_i32_0 : i32, i32
  }
  func.func @transform_3(%arg0: i32, %arg1: memref<1xf32, #tpu.memory_space<smem>>) -> (i32, i32) {
    %c0_i32 = arith.constant 0 : i32
    %c0_i32_0 = arith.constant 0 : i32
    return %arg0, %c0_i32 : i32, i32
  }
}

</mosaic_0001>

<bundles_post_ra>
// kernel: tpu_custom_call.1
= control target key start
LH: loop header
LB: loop body
LE: loop exit
PB: predicated region body
PF: predicated region fallthrough
CT: control target
= control target key end

     0   :  { %10 = vsyncpa [#allocation5], 0  ;;  %s578_s0 = inlined_call_operand.<no memory space> [shape: f32[1], index: 0, kind: input, shape index: {}]   ;;  %s579_s1 = inlined_call_operand.hbm [shape: f32[8,256], index: 1, kind: input, shape index: {}]   ;;  %s580_s2 = inlined_call_operand.hbm [shape: f32[8,256], index: 2, kind: input, shape index: {}]   ;;  %s581_s3 = inlined_call_operand.hbm [shape: bf16[256,256], index: 3, kind: input, shape index: {}]   ;;  %s582_s4 = inlined_call_operand.hbm [shape: f32[8,128], index: 4, kind: output, shape index: {}]  }
   0x1   :  { %11 = vsyncpa [#allocation8], 0 }
   0x2   :  { %12 = vsyncpa [#allocation6], 0  ;;  %s496_s15 = smov [#allocation7]   ;;  %s497_s17 = smov [#allocation4]  }
   0x3   :  { %s29_s16 = sshll.u32 %s496_s15, 4  ;;  %s19_s18 = sshll.u32 %s497_s17, 4  ;;  %s30_s16 = int_to_ptr.vmem [resolvable:$true] %s29_s16  ;;  %s20_s18 = int_to_ptr.vmem [resolvable:$true] %s19_s18 }
   0x4   :  { %s402_s21 = scalar_lea.hbm %s580_s2, 256 }
   0x5   :  { %p403_p0 = scmp.ne.s32.totalorder %s580_s2, %s402_s21  ;;  %p406_p1 = scmp.lt.u32.totalorder %s402_s21, %s580_s2 }
   0x7   :  { %p408_p2 = pnand %p406_p1, %p403_p0 }
   0x9   :  { %411 = shalt.err (!%p408_p2)
}
   0xa   :  { %s412_s26 = scalar_lea.vmem %s30_s16, 256  ;;  %p417_p4 = scmp.lt.s32.totalorder %s30_s16, %s30_s16 }
   0xb   :  { %p413_p3 = scmp.ne.s32.totalorder %s30_s16, %s412_s26  ;;  %p418_p5 = scmp.lt.s32.totalorder %s412_s26, %s412_s26 }
   0xd   :  { %p419_p6 = por %p418_p5, %p417_p4 }
   0xf   :  { %p420_p7 = pnand %p419_p6, %p413_p3 }
  0x11   :  { %423 = shalt.err (!%p420_p7)
}
  0x12   :  { %32 = dma.hbm_to_vmem [thread:$0]  %s580_s2, 256, %s30_s16, [#allocation8]  }
  0x13   :  { %s424_s5 = scalar_lea.hbm %s579_s1, 256 }
  0x14   :  { %p425_p8 = scmp.ne.s32.totalorder %s579_s1, %s424_s5  ;;  %p428_p9 = scmp.lt.u32.totalorder %s424_s5, %s579_s1 }
  0x16   :  { %p430_p10 = pnand %p428_p9, %p425_p8 }
  0x18   :  { %433 = shalt.err (!%p430_p10)
}
  0x19   :  { %s434_s10 = scalar_lea.vmem %s20_s18, 256  ;;  %p439_p12 = scmp.lt.s32.totalorder %s20_s18, %s20_s18 }
  0x1a   :  { %p435_p11 = scmp.ne.s32.totalorder %s20_s18, %s434_s10  ;;  %p440_p13 = scmp.lt.s32.totalorder %s434_s10, %s434_s10 }
  0x1c   :  { %p441_p0 = por %p440_p13, %p439_p12 }
  0x1e   :  { %p442_p1 = pnand %p441_p0, %p435_p11 }
  0x20   :  { %445 = shalt.err (!%p442_p1)
}
  0x21   :  { %22 = dma.hbm_to_vmem [thread:$0]  %s579_s1, 256, %s20_s18, [#allocation5]  }
  0x22   :  { %s498_s12 = smov [#allocation9]   ;;  %s446_s16 = scalar_lea.hbm %s581_s3, 4096 }
  0x23   :  { %s38_s13 = sshll.u32 %s498_s12, 4  ;;  %p447_p2 = scmp.ne.s32.totalorder %s581_s3, %s446_s16  ;;  %s39_s13 = int_to_ptr.vmem [resolvable:$true] %s38_s13 }
  0x24   :  { %p450_p3 = scmp.lt.u32.totalorder %s446_s16, %s581_s3 }
  0x26   :  { %p452_p4 = pnand %p450_p3, %p447_p2 }
  0x28   :  { %455 = shalt.err (!%p452_p4)
}
  0x29   :  { %s456_s22 = scalar_lea.vmem %s39_s13, 4096  ;;  %p461_p6 = scmp.lt.s32.totalorder %s39_s13, %s39_s13 }
  0x2a   :  { %p457_p5 = scmp.ne.s32.totalorder %s39_s13, %s456_s22  ;;  %p462_p7 = scmp.lt.s32.totalorder %s456_s22, %s456_s22 }
  0x2c   :  { %p463_p8 = por %p462_p7, %p461_p6 }
  0x2e   :  { %p464_p9 = pnand %p463_p8, %p457_p5 }
  0x30   :  { %467 = shalt.err (!%p464_p9)
}
  0x31   :  { %s499_s1 = smov 128   ;;  %s500_s18 = smov 8  }
  0x32   :  { %44 = dma.hbm_to_vmem [thread:$0]  %s581_s3, 4096, %s39_s13, [#allocation8], %s499_s1, %s499_s1, %s500_s18  }
  0x33   :  { %490 = dma.done.wait [#allocation5], 256  }
  0x34   :  { %491 = vsyncadd [#allocation5], 4294967040 }
  0x35   :  { %492 = dma.done.wait [#allocation8], 4352  }
  0x36   :  { %493 = vsyncadd [#allocation8], 4294962944  ;;  %v354_v0 = vld [vmem:[#allocation9 + $0x4] ss:$8 sps:$4 sm:$0xff]   ;;  %v356_v1 = vld [vmem:[#allocation9] ss:$8 sps:$4 sm:$0xff]   ;;  %v233_v43 = vstv %s578_s0 }
  0x37   :  { %253 = vmatprep.subr.bf16.mxu0 %v354_v0  ;;  %v357_v2 = vld [vmem:[#allocation9 + $0x14] ss:$8 sps:$4 sm:$0xff]   ;;  %v359_v3 = vld [vmem:[#allocation9 + $0x10] ss:$8 sps:$4 sm:$0xff]   ;;  %v360_v4 = vld [vmem:[#allocation9 + $0x24] ss:$8 sps:$4 sm:$0xff]  }
  0x38   :  { %255 = vmatpush1.bf16.msra.mxu0 %v356_v1  ;;  %v362_v5 = vld [vmem:[#allocation9 + $0x20] ss:$8 sps:$4 sm:$0xff]   ;;  %v363_v6 = vld [vmem:[#allocation9 + $0x34] ss:$8 sps:$4 sm:$0xff]   ;;  %v365_v7 = vld [vmem:[#allocation9 + $0x30] ss:$8 sps:$4 sm:$0xff]  }
  0x39   :  { %257 = vmatprep.subr.bf16.mxu0 %v357_v2  ;;  %v366_v8 = vld [vmem:[#allocation9 + $0x44] ss:$8 sps:$4 sm:$0xff]   ;;  %v368_v9 = vld [vmem:[#allocation9 + $0x40] ss:$8 sps:$4 sm:$0xff]   ;;  %v369_v10 = vld [vmem:[#allocation9 + $0x54] ss:$8 sps:$4 sm:$0xff]  }
  0x3a   :  { %v371_v11 = vld [vmem:[#allocation9 + $0x50] ss:$8 sps:$4 sm:$0xff]   ;;  %v372_v12 = vld [vmem:[#allocation9 + $0x64] ss:$8 sps:$4 sm:$0xff]   ;;  %v374_v14 = vld [vmem:[#allocation9 + $0x60] ss:$8 sps:$4 sm:$0xff]  }
  0x3b   :  { %v151_v13 = vld [vmem:[#allocation7 + $0x8] sm:$0xff]  ;;  %v378_v17 = vld [vmem:[#allocation9 + $0x84] ss:$8 sps:$4 sm:$0xff]   ;;  %v380_v18 = vld [vmem:[#allocation9 + $0x80] ss:$8 sps:$4 sm:$0xff]   ;;  %s501_s26 = smov [#allocation10]  }
  0x3c   :  { %259 = vmatpush1.bf16.msra.mxu0 %v359_v3  ;;  %216 = vmatprep.mubr.f32.mxu0 %v151_v13  ;;  %v375_v15 = vld [vmem:[#allocation9 + $0x74] ss:$8 sps:$4 sm:$0xff]   ;;  %v377_v16 = vld [vmem:[#allocation9 + $0x70] ss:$8 sps:$4 sm:$0xff]   ;;  %v384_v21 = vld [vmem:[#allocation9 + $0xa4] ss:$8 sps:$4 sm:$0xff]  }
  0x3d   :  { %261 = vmatprep.subr.bf16.mxu0 %v360_v4  ;;  %v381_v19 = vld [vmem:[#allocation9 + $0x94] ss:$8 sps:$4 sm:$0xff]   ;;  %v383_v20 = vld [vmem:[#allocation9 + $0x90] ss:$8 sps:$4 sm:$0xff]   ;;  %v386_v22 = vld [vmem:[#allocation9 + $0xa0] ss:$8 sps:$4 sm:$0xff]  }
  0x3e   :  { %v387_v23 = vld [vmem:[#allocation9 + $0xb4] ss:$8 sps:$4 sm:$0xff]   ;;  %v389_v24 = vld [vmem:[#allocation9 + $0xb0] ss:$8 sps:$4 sm:$0xff]   ;;  %v390_v25 = vld [vmem:[#allocation9 + $0xc4] ss:$8 sps:$4 sm:$0xff]  }
  0x3f   :  { %v392_v26 = vld [vmem:[#allocation9 + $0xc0] ss:$8 sps:$4 sm:$0xff]   ;;  %v393_v27 = vld [vmem:[#allocation9 + $0xd4] ss:$8 sps:$4 sm:$0xff]   ;;  %v395_v28 = vld [vmem:[#allocation9 + $0xd0] ss:$8 sps:$4 sm:$0xff]  }
  0x40   :  { %263 = vmatpush1.bf16.msra.mxu0 %v362_v5  ;;  %v396_v29 = vld [vmem:[#allocation9 + $0xe4] ss:$8 sps:$4 sm:$0xff]   ;;  %v398_v30 = vld [vmem:[#allocation9 + $0xe0] ss:$8 sps:$4 sm:$0xff]   ;;  %v399_v31 = vld [vmem:[#allocation9 + $0xf4] ss:$8 sps:$4 sm:$0xff]  }
  0x41   :  { %265 = vmatprep.subr.bf16.mxu0 %v363_v6  ;;  %v401_v32 = vld [vmem:[#allocation9 + $0xf0] ss:$8 sps:$4 sm:$0xff]   ;;  %v223_v34 = vld [vmem:[#allocation4] sm:$0xff]  ;;  %v224_v35 = vld [vmem:[#allocation4 + $0x8] sm:$0xff]  ;;  %s242_s27 = sshll.u32 %s501_s26, 4  ;;  %s243_s27 = int_to_ptr.vmem [resolvable:$true] %s242_s27 }
  0x42   :  { %v150_v33 = vld [vmem:[#allocation7] sm:$0xff]  ;;  %s468_s28 = scalar_lea.vmem %s243_s27, 128  ;;  %p473_p11 = scmp.lt.s32.totalorder %s243_s27, %s243_s27 }
  0x43   :  { %p469_p10 = scmp.ne.s32.totalorder %s243_s27, %s468_s28  ;;  %p474_p12 = scmp.lt.s32.totalorder %s468_s28, %s468_s28 }
  0x44   :  { %267 = vmatpush1.bf16.msra.mxu0 %v365_v7 }
  0x45   :  { %269 = vmatprep.subr.bf16.mxu0 %v366_v8  ;;  %p475_p13 = por %p474_p12, %p473_p11 }
  0x47   :  { %p476_p0 = pnand %p475_p13, %p469_p10 }
  0x48   :  { %271 = vmatpush1.bf16.msra.mxu0 %v368_v9 }
  0x49   :  { %273 = vmatprep.subr.bf16.mxu0 %v369_v10 }
  0x4c   :  { %275 = vmatpush1.bf16.msra.mxu0 %v371_v11 }
  0x4d   :  { %277 = vmatprep.subr.bf16.mxu0 %v372_v12 }
  0x50   :  { %279 = vmatpush1.bf16.msra.mxu0 %v374_v14 }
  0x51   :  { %281 = vmatprep.subr.bf16.mxu0 %v375_v15 }
  0x54   :  { %283 = vmatpush1.bf16.msra.mxu0 %v377_v16 }
  0x55   :  { %285 = vmatprep.subr.bf16.mxu0 %v378_v17 }
  0x58   :  { %287 = vmatpush1.bf16.msra.mxu0 %v380_v18 }
  0x59   :  { %289 = vmatprep.subr.bf16.mxu0 %v381_v19 }
  0x5c   :  { %291 = vmatpush1.bf16.msra.mxu0 %v383_v20 }
  0x5d   :  { %293 = vmatprep.subr.bf16.mxu0 %v384_v21 }
  0x60   :  { %295 = vmatpush1.bf16.msra.mxu0 %v386_v22 }
  0x61   :  { %297 = vmatprep.subr.bf16.mxu0 %v387_v23 }
  0x64   :  { %299 = vmatpush1.bf16.msra.mxu0 %v389_v24 }
  0x65   :  { %301 = vmatprep.subr.bf16.mxu0 %v390_v25 }
  0x68   :  { %303 = vmatpush1.bf16.msra.mxu0 %v392_v26 }
  0x69   :  { %305 = vmatprep.subr.bf16.mxu0 %v393_v27 }
  0x6c   :  { %307 = vmatpush1.bf16.msra.mxu0 %v395_v28 }
  0x6d   :  { %309 = vmatprep.subr.bf16.mxu0 %v396_v29 }
  0x70   :  { %311 = vmatpush1.bf16.msra.mxu0 %v398_v30 }
  0x71   :  { %313 = vmatprep.subr.bf16.mxu0 %v399_v31 }
  0x74   :  { %315 = vmatpush1.bf16.msra.mxu0 %v401_v32 }
  0x77   :  { %217 = vmatmul.mubr.f32.vlgmr.msra.gmra.mrb[0].mxu0 %v150_v33 }
 0x14a   :  { %v218_v36 = vpop.f32.mrb[0].mxu0 }
 0x14b   :  { %v225_v37 = vsub.f32 %v223_v34, %v218_v36  ;;  %v220_v38 = vpop.f32.mrb[1].mxu0 }
 0x14c   :  { %v226_v39 = vsub.f32 %v224_v35, %v220_v38 }
 0x14d   :  { %v227_v40 = vmul.f32 %v225_v37, %v225_v37 }
 0x14e   :  { %v228_v41 = vmul.f32 %v226_v39, %v226_v39 }
 0x150   :  { %v229_v42 = vadd.f32 %v228_v41, %v227_v40 }
 0x152   :  { %230 = vadd.xlane.f32.xlu0 %v229_v42 }
 0x1df   :  { %v231_v44 = vpop.xlane.xlu0 %230 }
 0x1e0   :  { %v234_v45 = vmul.f32 %v233_v43, %v231_v44 }
 0x1e2   :  { %235 = vst [vmem:[#allocation10] sm:$0xff] %v234_v45 }
 0x1e3   :  { %479 = shalt.err (!%p476_p0)
}
 0x1e4   :  { %s480_s5 = scalar_lea.hbm %s582_s4, 128 }
 0x1e5   :  { %p481_p1 = scmp.ne.s32.totalorder %s582_s4, %s480_s5  ;;  %p484_p2 = scmp.lt.u32.totalorder %s480_s5, %s582_s4 }
 0x1e7   :  { %p486_p3 = pnand %p484_p2, %p481_p1 }
 0x1e9   :  { %489 = shalt.err (!%p486_p3)
}
 0x1ea   :  { %245 = dma.vmem_to_hbm [thread:$0]  %s243_s27, 128, %s582_s4, [#allocation6]  }
 0x1eb   :  { %494 = dma.done.wait [#allocation6], 128  }
 0x1ec   :  { %495 = vsyncadd [#allocation6], 4294967168 }
 0x1ed   :  { %249 = vsyncpa [#allocation5], 1 }
 0x1ee   :  { %250 = vsyncpa [#allocation8], 1 }
 0x1ef   :  { %251 = vsyncpa [#allocation6], 1 }

</bundles_post_ra>
